<compile_context>
chip_gen: v7x
topology: tpu7x:2x2x1
jax: 0.10.0
libtpu: 0.0.40
codegen_flags: <defaults>
</compile_context>

<pallas_src>
import functools
import math

import jax
import jax.numpy as jnp
from jax.experimental import pallas as pl
from jax.experimental.pallas import tpu as pltpu

_LANE = 128
_SUBLANE = 8


def _round_up(x, m):
    return (x + m - 1) // m * m


# ------------------------------ Pallas kernel -------------------------------

def _mlp_layer_kernel(x_ref, w_ref, b_ref, o_ref, act_ref, *, din_p, dout_p):
    """One (batch_tile, layer) grid step of the fused MLP.

    x_ref  : (bm, din_p)   bf16  padded input tile (read only at l == 0)
    w_ref  : (1, Dp, Dp)   bf16  layer l's zero-padded, pre-transposed,
                                 residual-merged weight (streamed per layer)
    b_ref  : (1, 1, Dp)    f32   layer l's zero-padded, residual-merged bias
    o_ref  : (bm, dout_p)  f32   output tile (written only at l == L-1)
    act_ref: (bm, Dp)      bf16  VMEM scratch: activation carried across the
                                 "arbitrary" layer grid axis
    """
    l = pl.program_id(1)
    nl = pl.num_programs(1)
    is_first = l == 0
    is_last = l == nl - 1

    # ---- layer 0: read the (narrow) input tile directly, no act init copy --
    @pl.when(is_first)
    def _():
        y = jnp.dot(x_ref[...], w_ref[0, :din_p, :],
                    preferred_element_type=jnp.float32) + b_ref[0]
        # TODO(synk): the reference forward applies the (undefined) self.act
        # after every group; we use ReLU on hidden groups, linear output head.
        @pl.when(jnp.logical_not(is_last))
        def _():
            act_ref[...] = jnp.maximum(y, 0.0).astype(act_ref.dtype)

        @pl.when(is_last)                       # degenerate 1-layer network
        def _():
            o_ref[...] = y[:, :dout_p].astype(o_ref.dtype)

    # ---- hidden layers: act -> act -----------------------------------------
    @pl.when((l > 0) & (l < nl - 1))
    def _():
        y = jnp.dot(act_ref[...], w_ref[0],
                    preferred_element_type=jnp.float32) + b_ref[0]
        act_ref[...] = jnp.maximum(y, 0.0).astype(act_ref.dtype)

    # ---- output head: only the real (lane-aligned) output columns ----------
    @pl.when((l > 0) & is_last)
    def _():
        y = jnp.dot(act_ref[...], w_ref[0, :, :dout_p],
                    preferred_element_type=jnp.float32) + b_ref[0][:, :dout_p]
        o_ref[...] = y.astype(o_ref.dtype)


# ------------------------------ pallas_call glue ----------------------------

def forward_pallas(x, packed, *, bm=None, interpret=False):
    """Run the whole DynamicLinearNet forward as one pallas_call."""
    w, b = packed["w"], packed["b"]          # (L, Dp, Dp) bf16, (L, 1, Dp) f32
    din_p = packed["din_p"]
    dout_p = packed["dout_p"]
    out_size = packed["output_size"]
    L, Dp, _ = w.shape
    B, Din = x.shape

    # Batch tiling: sublane-aligned; aim for >= 2 "parallel" steps whenever
    # B > 8 so both v7x TensorCores get work; cap the tile at 256 rows.
    if bm is None:
        bm = min(256, max(_SUBLANE, _round_up(-(-B // 2), _SUBLANE)))
    B_pad = _round_up(max(B, bm), bm)

    # Input tile: bf16, padded only to the first layer's lane-aligned width.
    x_pad = jnp.zeros((B_pad, din_p), jnp.bfloat16).at[:B, :Din].set(
        x.astype(jnp.bfloat16))

    grid = (B_pad // bm, L)
    kernel = functools.partial(_mlp_layer_kernel, din_p=din_p, dout_p=dout_p)

    # Scoped-VMEM budget: double-buffered weight/bias/input/output blocks plus
    # the activation scratch, with headroom; capped at v7x physical (64 MiB).
    need = (2 * Dp * Dp * 2          # weight block, bf16, 2 buffers
            + 2 * Dp * 4             # bias block, f32, 2 buffers
            + 2 * bm * din_p * 2     # input tile, bf16, 2 buffers
            + 2 * bm * dout_p * 4    # output tile, f32, 2 buffers
            + bm * Dp * 2)           # activation scratch, bf16
    vmem_limit = int(min(max(2 * need + (4 << 20), 32 << 20), 64 << 20))

    out = pl.pallas_call(
        kernel,
        grid=grid,
        in_specs=[
            pl.BlockSpec((bm, din_p), lambda i, l: (i, 0)),     # input tile
            pl.BlockSpec((1, Dp, Dp), lambda i, l: (l, 0, 0)),  # layer weight
            pl.BlockSpec((1, 1, Dp), lambda i, l: (l, 0, 0)),   # layer bias
        ],
        out_specs=pl.BlockSpec((bm, dout_p), lambda i, l: (i, 0)),
        out_shape=jax.ShapeDtypeStruct((B_pad, dout_p), jnp.float32),
        scratch_shapes=[pltpu.VMEM((bm, Dp), jnp.bfloat16)],
        compiler_params=pltpu.CompilerParams(
            dimension_semantics=("parallel", "arbitrary"),
            vmem_limit_bytes=vmem_limit),
        interpret=interpret,
    )(x_pad, w, b)

    return out[:B, :out_size]


# ----------------------------- parameter setup ------------------------------

def _init_linear(key, in_features, out_features):
    """PyTorch-style nn.Linear init. Returns (W[out, in], b[out]) in f32."""
    k1, k2 = jax.random.split(key)
    bound = 1.0 / math.sqrt(in_features)
    w = jax.random.uniform(k1, (out_features, in_features), jnp.float32,
                           -bound, bound)
    b = jax.random.uniform(k2, (out_features,), jnp.float32, -bound, bound)
    return w, b


def build_dynamic_linear_net(key, input_size, output_size, hidden_sizes):
    """Mirrors DynamicLinearNet._build_network / _update_residual_layers."""
    layers = []   # each: dict(main=(W, b), residual=(Wr, br) or None)
    keys = iter(jax.random.split(key, 4 * (len(hidden_sizes) + 2)))

    if not hidden_sizes:
        layers.append({"main": _init_linear(next(keys), input_size, output_size),
                       "residual": None})
        return layers, []

    layers.append({"main": _init_linear(next(keys), input_size, hidden_sizes[0]),
                   "residual": None})
    for i in range(1, len(hidden_sizes)):
        in_f, out_f = hidden_sizes[i - 1], hidden_sizes[i]
        group = {"main": _init_linear(next(keys), in_f, out_f), "residual": None}
        if i % 3 == 2:
            # TODO(synk): PyTorch source builds the residual Linear with
            # in_features=hidden_sizes[i-2] but applies it to `identity`,
            # which has hidden_sizes[i-1] features; we use hidden_sizes[i-1]
            # so the forward is well-defined for heterogeneous hidden sizes
            # (identical for the equal-width example below).
            group["residual"] = _init_linear(next(keys), in_f, out_f)
        layers.append(group)
    layers.append({"main": _init_linear(next(keys), hidden_sizes[-1], output_size),
                   "residual": None})

    residual_layers = [i for i in range(len(hidden_sizes)) if (i + 1) % 3 == 0]
    return layers, residual_layers


def pack_params(layers, residual_layers, output_size, input_size,
                param_dtype=jnp.bfloat16, lane_mult=_LANE):
    """Merge residual branches into the main Linear (same input -> W+Wr, b+br,
    exactly what the module's merge_sub_layers does), transpose to [in, out],
    zero-pad the hidden width to a common lane multiple, and stack the layers
    so the kernel can stream one (1, Dp, Dp) weight block per grid step.

    lane_mult: 128 matches v5e's MXU; use 256 on v6e/v7x when the real widths
    are >= 256 (re-check the VMEM budget on v7x after aligning)."""
    dims = []
    for g in layers:
        wt, _ = g["main"]
        dims += [wt.shape[0], wt.shape[1]]
    Dp = _round_up(max(dims), lane_mult)
    din_p = _round_up(layers[0]["main"][0].shape[1], lane_mult)   # input width
    dout_p = _round_up(layers[-1]["main"][0].shape[0], lane_mult)  # output width

    w_list, b_list = [], []
    for idx, g in enumerate(layers):
        w, b = g["main"]                           # (out, in), (out,)
        if idx in residual_layers and g["residual"] is not None:
            wr, br = g["residual"]
            w = w + wr                             # same input -> add weights
            b = b + br
        out_f, in_f = w.shape
        wp = jnp.zeros((Dp, Dp), jnp.float32).at[:in_f, :out_f].set(w.T)
        bp = jnp.zeros((1, Dp), jnp.float32).at[0, :out_f].set(b)
        w_list.append(wp)
        b_list.append(bp)

    return {
        "w": jnp.stack(w_list).astype(param_dtype),   # (L, Dp, Dp) bf16
        "b": jnp.stack(b_list),                       # (L, 1, Dp)  f32
        "din_p": din_p,
        "dout_p": dout_p,
        "output_size": output_size,
        "input_size": input_size,
    }


# ------------------------------- references ---------------------------------

def forward_reference_f32(x, layers, residual_layers):
    """Pure-JAX f32 reference mirroring the module's per-group semantics."""
    n = len(layers)
    for idx, g in enumerate(layers):
        identity = x
        w, b = g["main"]
        y = x @ w.T + b
        if idx in residual_layers and g["residual"] is not None:
            wr, br = g["residual"]
            y = y + identity @ wr.T + br
        if idx < n - 1:
            y = jnp.maximum(y, 0.0)
        x = y
    return x


def forward_reference_packed(x, packed):
    """Pure-JAX reference with numerics identical to the kernel (bf16 matmul
    inputs, bf16 activation carry, f32 accumulation/bias/ReLU, merged
    residuals, the same per-layer weight slicing)."""
    w, b = packed["w"], packed["b"]
    din_p, dout_p = packed["din_p"], packed["dout_p"]
    L = w.shape[0]
    B, Din = x.shape
    h = jnp.zeros((B, din_p), jnp.bfloat16).at[:, :Din].set(
        x.astype(jnp.bfloat16))
    y = jnp.dot(h, w[0, :din_p, :], preferred_element_type=jnp.float32) + b[0]
    for l in range(1, L):
        h = jnp.maximum(y, 0.0).astype(jnp.bfloat16)
        if l == L - 1:
            y = (jnp.dot(h, w[l, :, :dout_p],
                         preferred_element_type=jnp.float32)
                 + b[l, :, :dout_p])
        else:
            y = jnp.dot(h, w[l], preferred_element_type=jnp.float32) + b[l]
    if L == 1:
        y = y[:, :dout_p]
    return y[:, :packed["output_size"]]


# ---------------------------------- main -------------------------------------

if __name__ == "__main__":
    key = jax.random.PRNGKey(0)
    k_param, k_data = jax.random.split(key)

    batch = 8
    input_size = 16
    output_size = 8
    hidden_sizes = [32, 32, 32, 32, 32, 32]   # residual groups at indices 2, 5

    layers, residual_layers = build_dynamic_linear_net(
        k_param, input_size, output_size, hidden_sizes)
    packed = pack_params(layers, residual_layers, output_size, input_size)

    x = jax.random.normal(k_data, (batch, input_size), jnp.float32)

    out = forward_pallas(x, packed)
    out = jax.block_until_ready(out)
    assert out.shape == (batch, output_size)

    # Tight check vs a pure-JAX model of the exact kernel numerics.
    ref_packed = forward_reference_packed(x, packed)
    assert jnp.allclose(out, ref_packed, atol=1e-4, rtol=1e-4), \
        "mismatch vs packed (bf16) reference"

    # Loose sanity check vs the full-f32 unfused module semantics (bf16
    # weights/activations introduce ~1e-2 absolute error through 7 layers).
    ref_f32 = forward_reference_f32(x, layers, residual_layers)
    assert float(jnp.max(jnp.abs(out - ref_f32))) < 1e-1, \
        "mismatch vs f32 module reference"

    print("KERNEL_OK")
</pallas_src>

<mosaic_0001>
module attributes {stable_mosaic.version = 11 : i64} {
  func.func @_mlp_layer_kernel(%arg0: i32, %arg1: i32, %arg2: memref<8x128xbf16, #tpu.memory_space<vmem>>, %arg3: memref<1x128x128xbf16, #tpu.memory_space<vmem>>, %arg4: memref<1x1x128xf32, #tpu.memory_space<vmem>>, %arg5: memref<8x128xf32, #tpu.memory_space<vmem>>, %arg6: memref<8x128xbf16, #tpu.memory_space<vmem>>) attributes {dimension_semantics = [#tpu.dimension_semantics<parallel>, #tpu.dimension_semantics<arbitrary>], iteration_bounds = array<i64: 1, 7>, scalar_prefetch = 0 : i64, scratch_operands = 1 : i64, tpu.core_type = #tpu.core_type<tc>, window_params = [{transform_indices = @transform_0, window_bounds = array<i64: 8, 128>}, {transform_indices = @transform_1, window_bounds = array<i64: 1, 128, 128>}, {transform_indices = @transform_2, window_bounds = array<i64: 1, 1, 128>}, {transform_indices = @transform_3, window_bounds = array<i64: 8, 128>}]} {
    %c0_i32 = arith.constant 0 : i32
    %0 = arith.cmpi eq, %arg1, %c0_i32 : i32
    %c6_i32 = arith.constant 6 : i32
    %1 = arith.cmpi eq, %arg1, %c6_i32 : i32
    %2 = arith.extui %0 : i1 to i32
    %c0_i32_0 = arith.constant 0 : i32
    %3 = arith.cmpi ne, %2, %c0_i32_0 : i32
    scf.if %3 {
      %c0 = arith.constant 0 : index
      %c0_6 = arith.constant 0 : index
      %13 = vector.load %arg2[%c0, %c0_6] : memref<8x128xbf16, #tpu.memory_space<vmem>>, vector<8x128xbf16>
      %c0_7 = arith.constant 0 : index
      %c0_8 = arith.constant 0 : index
      %c0_9 = arith.constant 0 : index
      %14 = vector.load %arg3[%c0_7, %c0_8, %c0_9] : memref<1x128x128xbf16, #tpu.memory_space<vmem>>, vector<1x128x128xbf16>
      %15 = vector.shape_cast %14 : vector<1x128x128xbf16> to vector<128x128xbf16>
      %cst = arith.constant dense<0.000000e+00> : vector<8x128xf32>
      %16 = tpu.matmul %13, %15, %cst {dimension_numbers = #tpu.dot_dimension_numbers<[1], [0], [0], [1], [0, 0, 1, 1], [], []>} : vector<8x128xbf16>, vector<128x128xbf16>, vector<8x128xf32> -> vector<8x128xf32>
      %c0_10 = arith.constant 0 : index
      %c0_11 = arith.constant 0 : index
      %c0_12 = arith.constant 0 : index
      %17 = vector.load %arg4[%c0_10, %c0_11, %c0_12] : memref<1x1x128xf32, #tpu.memory_space<vmem>>, vector<1x1x128xf32>
      %18 = vector.shape_cast %17 : vector<1x1x128xf32> to vector<1x128xf32>
      %19 = vector.broadcast %18 : vector<1x128xf32> to vector<8x128xf32>
      %20 = arith.addf %16, %19 : vector<8x128xf32>
      %true = arith.constant true
      %21 = arith.xori %1, %true : i1
      %22 = arith.extui %21 : i1 to i32
      %c0_i32_13 = arith.constant 0 : i32
      %23 = arith.cmpi ne, %22, %c0_i32_13 : i32
      scf.if %23 {
        %cst_15 = arith.constant 0.000000e+00 : f32
        %26 = vector.broadcast %cst_15 : f32 to vector<8x128xf32>
        %27 = arith.maximumf %20, %26 : vector<8x128xf32>
        %28 = arith.truncf %27 : vector<8x128xf32> to vector<8x128xbf16>
        %c0_16 = arith.constant 0 : index
        %c0_17 = arith.constant 0 : index
        %29 = vector.load %arg6[%c0_16, %c0_17] : memref<8x128xbf16, #tpu.memory_space<vmem>>, vector<8x128xbf16>
        tpu.vector_store %arg6[%c0_16, %c0_17], %28 {strides = array<i32>} : memref<8x128xbf16, #tpu.memory_space<vmem>>, vector<8x128xbf16>,
      } else {
      }
      %24 = arith.extui %1 : i1 to i32
      %c0_i32_14 = arith.constant 0 : i32
      %25 = arith.cmpi ne, %24, %c0_i32_14 : i32
      scf.if %25 {
        %c0_15 = arith.constant 0 : index
        %c0_16 = arith.constant 0 : index
        %26 = vector.load %arg5[%c0_15, %c0_16] : memref<8x128xf32, #tpu.memory_space<vmem>>, vector<8x128xf32>
        tpu.vector_store %arg5[%c0_15, %c0_16], %20 {strides = array<i32>} : memref<8x128xf32, #tpu.memory_space<vmem>>, vector<8x128xf32>,
      } else {
      }
    } else {
    }
    %c0_i32_1 = arith.constant 0 : i32
    %4 = arith.cmpi sgt, %arg1, %c0_i32_1 : i32
    %c6_i32_2 = arith.constant 6 : i32
    %5 = arith.cmpi slt, %arg1, %c6_i32_2 : i32
    %6 = arith.andi %4, %5 : i1
    %7 = arith.extui %6 : i1 to i32
    %c0_i32_3 = arith.constant 0 : i32
    %8 = arith.cmpi ne, %7, %c0_i32_3 : i32
    scf.if %8 {
      %c0 = arith.constant 0 : index
      %c0_6 = arith.constant 0 : index
      %13 = vector.load %arg6[%c0, %c0_6] : memref<8x128xbf16, #tpu.memory_space<vmem>>, vector<8x128xbf16>
      %c0_7 = arith.constant 0 : index
      %c0_8 = arith.constant 0 : index
      %c0_9 = arith.constant 0 : index
      %14 = vector.load %arg3[%c0_7, %c0_8, %c0_9] : memref<1x128x128xbf16, #tpu.memory_space<vmem>>, vector<1x128x128xbf16>
      %15 = vector.shape_cast %14 : vector<1x128x128xbf16> to vector<128x128xbf16>
      %cst = arith.constant dense<0.000000e+00> : vector<8x128xf32>
      %16 = tpu.matmul %13, %15, %cst {dimension_numbers = #tpu.dot_dimension_numbers<[1], [0], [0], [1], [0, 0, 1, 1], [], []>} : vector<8x128xbf16>, vector<128x128xbf16>, vector<8x128xf32> -> vector<8x128xf32>
      %c0_10 = arith.constant 0 : index
      %c0_11 = arith.constant 0 : index
      %c0_12 = arith.constant 0 : index
      %17 = vector.load %arg4[%c0_10, %c0_11, %c0_12] : memref<1x1x128xf32, #tpu.memory_space<vmem>>, vector<1x1x128xf32>
      %18 = vector.shape_cast %17 : vector<1x1x128xf32> to vector<1x128xf32>
      %19 = vector.broadcast %18 : vector<1x128xf32> to vector<8x128xf32>
      %20 = arith.addf %16, %19 : vector<8x128xf32>
      %cst_13 = arith.constant 0.000000e+00 : f32
      %21 = vector.broadcast %cst_13 : f32 to vector<8x128xf32>
      %22 = arith.maximumf %20, %21 : vector<8x128xf32>
      %23 = arith.truncf %22 : vector<8x128xf32> to vector<8x128xbf16>
      %c0_14 = arith.constant 0 : index
      %c0_15 = arith.constant 0 : index
      %24 = vector.load %arg6[%c0_14, %c0_15] : memref<8x128xbf16, #tpu.memory_space<vmem>>, vector<8x128xbf16>
      tpu.vector_store %arg6[%c0_14, %c0_15], %23 {strides = array<i32>} : memref<8x128xbf16, #tpu.memory_space<vmem>>, vector<8x128xbf16>,
    } else {
    }
    %c0_i32_4 = arith.constant 0 : i32
    %9 = arith.cmpi sgt, %arg1, %c0_i32_4 : i32
    %10 = arith.andi %9, %1 : i1
    %11 = arith.extui %10 : i1 to i32
    %c0_i32_5 = arith.constant 0 : i32
    %12 = arith.cmpi ne, %11, %c0_i32_5 : i32
    scf.if %12 {
      %c0 = arith.constant 0 : index
      %c0_6 = arith.constant 0 : index
      %13 = vector.load %arg6[%c0, %c0_6] : memref<8x128xbf16, #tpu.memory_space<vmem>>, vector<8x128xbf16>
      %c0_7 = arith.constant 0 : index
      %c0_8 = arith.constant 0 : index
      %c0_9 = arith.constant 0 : index
      %14 = vector.load %arg3[%c0_7, %c0_8, %c0_9] : memref<1x128x128xbf16, #tpu.memory_space<vmem>>, vector<1x128x128xbf16>
      %15 = vector.shape_cast %14 : vector<1x128x128xbf16> to vector<128x128xbf16>
      %cst = arith.constant dense<0.000000e+00> : vector<8x128xf32>
      %16 = tpu.matmul %13, %15, %cst {dimension_numbers = #tpu.dot_dimension_numbers<[1], [0], [0], [1], [0, 0, 1, 1], [], []>} : vector<8x128xbf16>, vector<128x128xbf16>, vector<8x128xf32> -> vector<8x128xf32>
      %c0_10 = arith.constant 0 : index
      %c0_11 = arith.constant 0 : index
      %c0_12 = arith.constant 0 : index
      %17 = vector.load %arg4[%c0_10, %c0_11, %c0_12] : memref<1x1x128xf32, #tpu.memory_space<vmem>>, vector<1x1x128xf32>
      %18 = vector.shape_cast %17 : vector<1x1x128xf32> to vector<1x128xf32>
      %19 = vector.broadcast %18 : vector<1x128xf32> to vector<8x128xf32>
      %20 = arith.addf %16, %19 : vector<8x128xf32>
      %c0_13 = arith.constant 0 : index
      %c0_14 = arith.constant 0 : index
      %21 = vector.load %arg5[%c0_13, %c0_14] : memref<8x128xf32, #tpu.memory_space<vmem>>, vector<8x128xf32>
      tpu.vector_store %arg5[%c0_13, %c0_14], %20 {strides = array<i32>} : memref<8x128xf32, #tpu.memory_space<vmem>>, vector<8x128xf32>,
    } else {
    }
    return
  }
  func.func @transform_0(%arg0: i32, %arg1: i32) -> (i32, i32) {
    %c0_i32 = arith.constant 0 : i32
    %c0_i32_0 = arith.constant 0 : i32
    return %arg0, %c0_i32 : i32, i32
  }
  func.func @transform_1(%arg0: i32, %arg1: i32) -> (i32, i32, i32) {
    %c0_i32 = arith.constant 0 : i32
    %c0_i32_0 = arith.constant 0 : i32
    %c0_i32_1 = arith.constant 0 : i32
    return %arg1, %c0_i32, %c0_i32_0 : i32, i32, i32
  }
  func.func @transform_2(%arg0: i32, %arg1: i32) -> (i32, i32, i32) {
    %c0_i32 = arith.constant 0 : i32
    %c0_i32_0 = arith.constant 0 : i32
    %c0_i32_1 = arith.constant 0 : i32
    return %arg1, %c0_i32, %c0_i32_0 : i32, i32, i32
  }
  func.func @transform_3(%arg0: i32, %arg1: i32) -> (i32, i32) {
    %c0_i32 = arith.constant 0 : i32
    %c0_i32_0 = arith.constant 0 : i32
    return %arg0, %c0_i32 : i32, i32
  }
}

</mosaic_0001>

<bundles_post_ra>
// kernel: tpu_custom_call.1
= control target key start
LH: loop header
LB: loop body
LE: loop exit
PB: predicated region body
PF: predicated region fallthrough
CT: control target
= control target key end

     0   :  { %8 = vsyncpa [#allocation4], 0  ;;  %s1347_s0 = inlined_call_operand.hbm [shape: bf16[8,128], index: 0, kind: input, shape index: {}]   ;;  %s1348_s1 = inlined_call_operand.hbm [shape: bf16[7,128,128], index: 1, kind: input, shape index: {}]   ;;  %s1349_s2 = inlined_call_operand.vmem [shape: f32[7,1,128], index: 2, kind: input, shape index: {}]   ;;  %s1350_s3 = inlined_call_operand.hbm [shape: f32[8,128], index: 3, kind: output, shape index: {}]  }
   0x1   :  { %9 = vsyncpa [#allocation7], 0 }
   0x2   :  { %11 = vsyncpa [#allocation7 + $0x1], 0 }
   0x3   :  { %12 = vsyncpa [#allocation5], 0  ;;  %s1100_s12 = smov 0   ;;  %s1102_s13 = smov 0  }
   0x4   :  { %s1104_s14 = smov 0   ;;  %s1106_s15 = smov 0  }
   0x5   :  { %s1108_s16 = smov 0   ;;  %s1110_s17 = smov 0  }
   0x6 LB: > { %s688_s18 = sadd.s32 4294967295, %s1067_s17   ;;  %s63_s19 = sadd.s32 1, %s1055_s14  ;;  %s1067_s17 = sphi %s1110_s17, %s18_s17   ;;  %s1063_s16 = sphi %s1108_s16, %s1371_s16   ;;  %s1059_s15 = sphi %s1106_s15, %s1370_s15   ;;  %s1055_s14 = sphi %s1104_s14, %s1369_s14   ;;  %s1051_s13 = sphi %s1102_s13, %s1368_s13   ;;  %s1047_s12 = sphi %s1100_s12, %s1367_s12  }
   0x7   : > { %p70_p0 = scmp.ne.s32.totalorder %s1055_s14, %s1051_s13  ;;  %p71_p1 = scmp.eq.s32.totalorder %s1067_s17, 0 }
   0x8   : > { %p76_p2 = scmp.ne.s32.totalorder %s1051_s13, %s1047_s12  ;;  %p1136_p3 = scmp.eq.s32.totalorder %s688_s18, 0 }
   0x9   : > { %p72_p4 = por %p71_p1, %p70_p0  ;;  %p689_p5 = scmp.ge.s32.totalorder %s1067_s17, 1 }
   0xa   : > { %s1356_s20 = scalar_select %p1136_p3, 1, 0 }
   0xb   : > { %p1143_p6 = por %p1136_p3, %p76_p2  ;;  %p139_p7 = scmp.lt.s32.totalorder %s1067_s17, 8 }
   0xc   : > { %s1069_s23 = smov [#allocation3]   ;;  %p839_p10 = scmp.lt.s32.totalorder %s1067_s17, 7 }
   0xd   : > { %s1357_s21 = scalar_select %p1143_p6, 1, 0 }
   0xe   : > { %p1148_p8 = pnand %p689_p5, %p139_p7  ;;  %s154_s24 = sshll.u32 %s1069_s23, 4  ;;  %s155_s24 = int_to_ptr.vmem [resolvable:$true] %s154_s24 }
   0xf   : > { %s165_s25 = sand.u32 1, %s1055_s14   ;;  %p1162_p12 = pnand %p839_p10, %p72_p4 }
  0x10   : > { %s1358_s22 = scalar_select %p1148_p8, 1, 0 }
  0x11   : > { %p830_p9 = pneg %p1148_p8  ;;  %s925_s30 = scalar_lea.hbm %s1347_s0, 64 }
  0x12   : > { %s1360_s27 = scalar_select %p1162_p12, 1, 0 }
  0x13   : > { %p1158_p11 = pnand %p830_p9, %p1136_p3  ;;  %p926_p13 = scmp.ne.s32.totalorder %s1347_s0, %s925_s30 }
  0x14   : > { %p932_p5 = scmp.lt.u32.totalorder %s925_s30, %s1347_s0 }
  0x15   : > { %p927_p0 = pneg %p1158_p11 }
  0x17   : > { %p928_p1 = pnand %p927_p0, %p926_p13 }
  0x19   : > { %p929_p2 = pneg %p928_p1 }
  0x1b   : > { %p934_p4 = pnand %p932_p5, %p929_p2 }
  0x1d   : > { %937 = shalt.err (!%p934_p4)
}
  0x1e   : > { %s938_s8 = scalar_lea.vmem %s155_s24, 64  ;;  %p946_p6 = scmp.lt.s32.totalorder %s155_s24, %s155_s24 }
  0x1f   : > { %p939_p7 = scmp.ne.s32.totalorder %s155_s24, %s938_s8  ;;  %p947_p3 = scmp.lt.s32.totalorder %s938_s8, %s938_s8 }
  0x21   : > { %p941_p9 = pnand %p939_p7, %p927_p0  ;;  %p948_p8 = por %p947_p3, %p946_p6 }
  0x23   : > { %p942_p10 = pneg %p941_p9 }
  0x25   : > { %p949_p12 = pnand %p948_p8, %p942_p10 }
  0x27   : > { %952 = shalt.err (!%p949_p12)
}
  0x28   : > { %833 = dma.hbm_to_vmem [thread:$0]  (!%p1158_p11), %s1347_s0, 64, %s155_s24, [#allocation4]  }
  0x29   : > { %s27_s11 = sadd.s32 1, %s1063_s16  ;;  %s692_s12 = sshll.u32 %s165_s25, 6 }
  0x2a   : > { %p28_p13 = scmp.ge.s32.totalorder %s27_s11, 7  ;;  %s732_s23 = sshll.u32 %s1063_s16, 10 }
  0x2b   : > { %s169_s28 = scalar_lea.vmem [#allocation6], %s692_s12  ;;  %s1191_s4 = scalar_lea.hbm %s1348_s1, %s732_s23 }
  0x2c   : > { %s176_s29 = sshll.u32 %s169_s28, 4  ;;  %s1373_s11 = smov (%p28_p13, %s27_s11), 0  ;;  %s1193_s29 = int_to_ptr.vmem [resolvable:$true] %s176_s29 }
  0x2d   : > { %s60_s24 = ssub.s32 %s1063_s16, %s1373_s11  ;;  %s1203_s6 = scalar_lea.sflag [#allocation7], %s165_s25 }
  0x2e   : > { %p1197_p3 = scmp.eq.s32.totalorder %s60_s24, 0  ;;  %s953_s7 = scalar_lea.hbm %s1191_s4, 1024 }
  0x2f   : > { %p954_p6 = scmp.ne.s32.totalorder %s1191_s4, %s953_s7  ;;  %p1362_p8 = scmp.ne.s32.totalorder %s1360_s27, 0 }
  0x30   : > { %s958_s10 = scalar_lea.hbm %s1348_s1, 7168  ;;  %p959_p1 = scmp.lt.u32.totalorder %s1191_s4, %s1348_s1 }
  0x31   : > { %p955_p11 = pneg %p1362_p8  ;;  %p960_p2 = scmp.lt.u32.totalorder %s958_s10, %s953_s7 }
  0x32   : > { %p962_p4 = scmp.lt.u32.totalorder %s953_s7, %s1191_s4 }
  0x33   : > { %p956_p12 = pnand %p955_p11, %p954_p6  ;;  %p961_p5 = por %p960_p2, %p959_p1 }
  0x35   : > { %p957_p0 = pneg %p956_p12  ;;  %p963_p7 = por %p962_p4, %p961_p5 }
  0x37   : > { %p964_p9 = pnand %p963_p7, %p957_p0 }
  0x39   : > { %967 = shalt.err (!%p964_p9)
}
  0x3a   : > { %s968_s25 = scalar_lea.vmem %s1193_s29, 1024  ;;  %s1070_s28 = smov [#allocation6]  }
  0x3b   : > { %p969_p10 = scmp.ne.s32.totalorder %s1193_s29, %s968_s25  ;;  %s973_s26 = sshll.u32 %s1070_s28, 4  ;;  %s974_s26 = int_to_ptr.vmem [resolvable:$false] %s973_s26 }
  0x3c   : > { %s975_s30 = scalar_lea.vmem %s974_s26, 2048  ;;  %p976_p12 = scmp.lt.s32.totalorder %s1193_s29, %s974_s26 }
  0x3d   : > { %p971_p13 = pnand %p969_p10, %p955_p11  ;;  %p977_p1 = scmp.lt.s32.totalorder %s975_s30, %s968_s25 }
  0x3f   : > { %p972_p6 = pneg %p971_p13  ;;  %p978_p2 = por %p977_p1, %p976_p12 }
  0x41   : > { %p979_p5 = pnand %p978_p2, %p972_p6 }
  0x43   : > { %982 = shalt.err (!%p979_p5)
}
  0x44   : > { %s1071_s24 = smov 64   ;;  %s1072_s7 = smov 4  }
  0x45   : > { %837 = dma.hbm_to_vmem [thread:$0]  (!%p1362_p8), %s1191_s4, 1024, %s1193_s29, %s1203_s6, %s1071_s24, %s1071_s24, %s1072_s7  }
  0x46   : > { %s1236_s8 = scalar_select %p1197_p3, %s1055_s14, %s63_s19  }
  0x47   : > { %p1363_p11 = scmp.ne.s32.totalorder %s1358_s22, 0 }
  0x48   : > { %p1364_p0 = scmp.ne.s32.totalorder (!%p1363_p11), %s1356_s20, 0 }
  0x49   : > { %194 = sbr.rel (%p1363_p11) target bundleno = 878 (0x36e), region = 32 }
  0x50   : > { %1034 = dma.done.wait (%p1364_p0), [#allocation4], 64  }
  0x51   : > { %1036 = vsyncadd (%p1364_p0), [#allocation4], 4294967232  ;;  %s200_s9 = sand.u32 1, %s1051_s13   ;;  %p1365_p8 = scmp.ne.s32.totalorder %s1357_s21, 0 }
  0x52   : > { %s697_s10 = sshll.u32 %s200_s9, 6  ;;  %s201_s12 = scalar_lea.sflag [#allocation7], %s200_s9 }
  0x53   : > { %s1245_s27 = scalar_lea.vmem [#allocation6], %s697_s10 }
  0x54   : > { %1038 = dma.done.wait (%p1365_p8), %s201_s12, 1024  }
  0x55   : > { %1040 = vsyncadd (%p1365_p8), %s201_s12, 4294966272  ;;  %p225_p3 = scmp.lt.s32.totalorder %s1059_s15, 6  ;;  %p230_p4 = scmp.eq.s32.totalorder %s1059_s15, 6 }
  0x56   : > { %p698_p7 = scmp.ne.s32.totalorder %s1059_s15, 0 }
  0x57   : > { %s226_s19 = scalar_select %p225_p3, %s1059_s15, 6 }
  0x58   : > { %233 = sbr.rel (%p698_p7) target bundleno = 349 (0x15d), region = 44  ;;  %v901_v0 = vld [vmem:[%s1245_s27] sm:$0xff] (!%p698_p7)   ;;  %v1073_v1 = vmov (!%p698_p7), 0.0   ;;  %v902_v2 = vld [vmem:[%s1245_s27 + $0x8] sm:$0xff] (!%p698_p7)   ;;  %vm1074_vm0 = vmmov (!%p698_p7), 0   ;;  %v903_v3 = vld [vmem:[%s1245_s27 + $0x10] sm:$0xff] (!%p698_p7)  }
  0x59   : > { %s1259_s29 = scalar_lea.vmem %s1349_s2, %s226_s19  ;;  %760 = vmatprep.subr.bf16.mxu0 (!%p698_p7), %v1073_v1  ;;  %776 = vmatprep.mubr.msk.bf16.mxu0 (!%p698_p7), %vm1074_vm0, %v1073_v1  ;;  %v904_v4 = vld [vmem:[%s1245_s27 + $0x18] sm:$0xff] (!%p698_p7)   ;;  %v905_v5 = vld [vmem:[%s1245_s27 + $0x20] sm:$0xff] (!%p698_p7)   ;;  %v906_v6 = vld [vmem:[%s1245_s27 + $0x28] sm:$0xff] (!%p698_p7)  }
  0x5a   : > { %761 = vmatpush3.bf16.msra.mxu0 (!%p698_p7), %v901_v0  ;;  %v907_v7 = vld [vmem:[%s1245_s27 + $0x30] sm:$0xff] (!%p698_p7)   ;;  %v908_v8 = vld [vmem:[%s1245_s27 + $0x38] sm:$0xff] (!%p698_p7)  }
  0x5b   : > { %762 = vmatprep.subr.bf16.mxu0 (!%p698_p7), %v1073_v1  ;;  %v234_v9 = vld [vmem:[#allocation3] sm:$0xf] (!%p698_p7)  ;;  %v699_v10 = vld [vmem:[%s1259_s29] ss:$0 sm:$0xff] (!%p698_p7) }
  0x5e   : > { %763 = vmatpush3.bf16.msra.mxu0 (!%p698_p7), %v902_v2 }
  0x5f   : > { %764 = vmatprep.subr.bf16.mxu0 %v1073_v1 }
  0x62   : > { %765 = vmatpush3.bf16.msra.mxu0 %v903_v3 }
  0x63   : > { %766 = vmatprep.subr.bf16.mxu0 %v1073_v1 }
  0x66   : > { %767 = vmatpush3.bf16.msra.mxu0 %v904_v4 }
  0x67   : > { %768 = vmatprep.subr.bf16.mxu0 %v1073_v1 }
  0x6a   : > { %769 = vmatpush3.bf16.msra.mxu0 %v905_v5 }
  0x6b   : > { %770 = vmatprep.subr.bf16.mxu0 %v1073_v1 }
  0x6e   : > { %771 = vmatpush3.bf16.msra.mxu0 %v906_v6 }
  0x6f   : > { %772 = vmatprep.subr.bf16.mxu0 %v1073_v1 }
  0x72   : > { %773 = vmatpush3.bf16.msra.mxu0 %v907_v7 }
  0x73   : > { %774 = vmatprep.subr.bf16.mxu0 %v1073_v1 }
  0x76   : > { %775 = vmatpush3.bf16.msra.mxu0 %v908_v8 }
  0x79   : > { %777 = vmatmul.mubr.bf16.vlgmr.msra.gmra.mrb[0].mxu0 %v234_v9 }
 0x149   : > { %349 = sbr.rel (%p230_p4) target bundleno = 340 (0x154), region = 48 }
 0x14c   : > { %v340_v11 = vpop.f32.mrb[0].mxu0 }
 0x14d   : > { %v341_v12 = vadd.f32 %v699_v10, %v340_v11  ;;  %v778_v13 = vpop.f32.mrb[1].mxu0 }
 0x14e   : > { %v343_v14 = vpop.f32.mrb[2].mxu0 }
 0x14f   : > { %v779_v15 = vpop.f32.mrb[3].mxu0  ;;  %v350_v16 = vmax.f32 (!%p230_p4), %v341_v12, 0.0 }
 0x151   : > { %v351_v17 = vpack.c.bf16 %v350_v16, %v350_v16 }
 0x153   : > { %352 = vst [vmem:[#allocation2] sm:$0xf] %v351_v17 }
 0x154 PF: > { %p709_p9 = scmp.ne.s32.totalorder %s1059_s15, 6 }
 0x155   : > { %356 = vst [vmem:[#allocation8] sm:$0xff] (!%p709_p9), %v341_v12 }
 0x156   : > { %355 = sbr.rel (%p709_p9) target bundleno = 349 (0x15d), region = 52 }
 0x15d PF: > { %p357_p10 = scmp.gt.s32.totalorder %s1059_s15, 0 }
 0x15f   : > { %p359_p13 = pnand %p357_p10, %p225_p3 }
 0x160   : > { %v909_v18 = vld [vmem:[%s1245_s27] sm:$0xff] (!%p359_p13)   ;;  %v1075_v19 = vmov (!%p359_p13), 0.0   ;;  %v910_v20 = vld [vmem:[%s1245_s27 + $0x8] sm:$0xff] (!%p359_p13)   ;;  %vm1076_vm1 = vmmov (!%p359_p13), 0   ;;  %v911_v21 = vld [vmem:[%s1245_s27 + $0x10] sm:$0xff] (!%p359_p13)  }
 0x161   : > { %362 = sbr.rel (%p359_p13) target bundleno = 604 (0x25c), region = 56  ;;  %780 = vmatprep.subr.bf16.mxu0 (!%p359_p13), %v1075_v19  ;;  %796 = vmatprep.mubr.msk.bf16.mxu0 (!%p359_p13), %vm1076_vm1, %v1075_v19  ;;  %v912_v22 = vld [vmem:[%s1245_s27 + $0x18] sm:$0xff] (!%p359_p13)   ;;  %v913_v23 = vld [vmem:[%s1245_s27 + $0x20] sm:$0xff] (!%p359_p13)   ;;  %v914_v24 = vld [vmem:[%s1245_s27 + $0x28] sm:$0xff] (!%p359_p13)  }
 0x162   : > { %781 = vmatpush3.bf16.msra.mxu0 (!%p359_p13), %v909_v18  ;;  %v915_v25 = vld [vmem:[%s1245_s27 + $0x30] sm:$0xff] (!%p359_p13)   ;;  %v916_v26 = vld [vmem:[%s1245_s27 + $0x38] sm:$0xff] (!%p359_p13)  }
 0x163   : > { %782 = vmatprep.subr.bf16.mxu0 (!%p359_p13), %v1075_v19  ;;  %v363_v27 = vld [vmem:[#allocation2] sm:$0xf] (!%p359_p13)  ;;  %v710_v28 = vld [vmem:[%s1259_s29] ss:$0 sm:$0xff] (!%p359_p13) }
 0x166   : > { %783 = vmatpush3.bf16.msra.mxu0 (!%p359_p13), %v910_v20 }
 0x167   : > { %784 = vmatprep.subr.bf16.mxu0 (!%p359_p13), %v1075_v19 }
 0x16a   : > { %785 = vmatpush3.bf16.msra.mxu0 %v911_v21 }
 0x16b   : > { %786 = vmatprep.subr.bf16.mxu0 %v1075_v19 }
 0x16e   : > { %787 = vmatpush3.bf16.msra.mxu0 %v912_v22 }
 0x16f   : > { %788 = vmatprep.subr.bf16.mxu0 %v1075_v19 }
 0x172   : > { %789 = vmatpush3.bf16.msra.mxu0 %v913_v23 }
 0x173   : > { %790 = vmatprep.subr.bf16.mxu0 %v1075_v19 }
 0x176   : > { %791 = vmatpush3.bf16.msra.mxu0 %v914_v24 }
 0x177   : > { %792 = vmatprep.subr.bf16.mxu0 %v1075_v19 }
 0x17a   : > { %793 = vmatpush3.bf16.msra.mxu0 %v915_v25 }
 0x17b   : > { %794 = vmatprep.subr.bf16.mxu0 %v1075_v19 }
 0x17e   : > { %795 = vmatpush3.bf16.msra.mxu0 %v916_v26 }
 0x181   : > { %797 = vmatmul.mubr.bf16.vlgmr.msra.gmra.mrb[0].mxu0 %v363_v27 }
 0x254   : > { %v469_v29 = vpop.f32.mrb[0].mxu0 }
 0x255   : > { %v470_v30 = vadd.f32 %v710_v28, %v469_v29  ;;  %v798_v31 = vpop.f32.mrb[1].mxu0 }
 0x256   : > { %v472_v32 = vpop.f32.mrb[2].mxu0 }
 0x257   : > { %v475_v33 = vmax.f32 %v470_v30, 0.0  ;;  %v799_v34 = vpop.f32.mrb[3].mxu0 }
 0x259   : > { %v476_v35 = vpack.c.bf16 %v475_v33, %v475_v33 }
 0x25b   : > { %477 = vst [vmem:[#allocation2] sm:$0xf] %v476_v35 }
 0x25c PF: > { %p478_p6 = pnand %p357_p10, %p230_p4 }
 0x25d   : > { %v917_v36 = vld [vmem:[%s1245_s27] sm:$0xff] (!%p478_p6)   ;;  %v1077_v37 = vmov (!%p478_p6), 0.0   ;;  %v918_v38 = vld [vmem:[%s1245_s27 + $0x8] sm:$0xff] (!%p478_p6)   ;;  %vm1078_vm2 = vmmov (!%p478_p6), 0   ;;  %v919_v39 = vld [vmem:[%s1245_s27 + $0x10] sm:$0xff] (!%p478_p6)  }
 0x25e   : > { %481 = sbr.rel (%p478_p6) target bundleno = 853 (0x355), region = 60  ;;  %800 = vmatprep.subr.bf16.mxu0 (!%p478_p6), %v1077_v37  ;;  %816 = vmatprep.mubr.msk.bf16.mxu0 (!%p478_p6), %vm1078_vm2, %v1077_v37  ;;  %v920_v40 = vld [vmem:[%s1245_s27 + $0x18] sm:$0xff] (!%p478_p6)   ;;  %v921_v41 = vld [vmem:[%s1245_s27 + $0x20] sm:$0xff] (!%p478_p6)   ;;  %v922_v42 = vld [vmem:[%s1245_s27 + $0x28] sm:$0xff] (!%p478_p6)  }
 0x25f   : > { %801 = vmatpush3.bf16.msra.mxu0 (!%p478_p6), %v917_v36  ;;  %v923_v43 = vld [vmem:[%s1245_s27 + $0x30] sm:$0xff] (!%p478_p6)   ;;  %v924_v44 = vld [vmem:[%s1245_s27 + $0x38] sm:$0xff] (!%p478_p6)  }
 0x260   : > { %802 = vmatprep.subr.bf16.mxu0 (!%p478_p6), %v1077_v37  ;;  %v719_v46 = vld [vmem:[%s1259_s29] ss:$0 sm:$0xff] (!%p478_p6) }
 0x262   : > { %v482_v45 = vld [vmem:[#allocation2] sm:$0xf] (!%p478_p6) }
 0x263   : > { %803 = vmatpush3.bf16.msra.mxu0 (!%p478_p6), %v918_v38 }
 0x264   : > { %804 = vmatprep.subr.bf16.mxu0 (!%p478_p6), %v1077_v37 }
 0x267   : > { %805 = vmatpush3.bf16.msra.mxu0 %v919_v39 }
 0x268   : > { %806 = vmatprep.subr.bf16.mxu0 %v1077_v37 }
 0x26b   : > { %807 = vmatpush3.bf16.msra.mxu0 %v920_v40 }
 0x26c   : > { %808 = vmatprep.subr.bf16.mxu0 %v1077_v37 }
 0x26f   : > { %809 = vmatpush3.bf16.msra.mxu0 %v921_v41 }
 0x270   : > { %810 = vmatprep.subr.bf16.mxu0 %v1077_v37 }
 0x273   : > { %811 = vmatpush3.bf16.msra.mxu0 %v922_v42 }
 0x274   : > { %812 = vmatprep.subr.bf16.mxu0 %v1077_v37 }
 0x277   : > { %813 = vmatpush3.bf16.msra.mxu0 %v923_v43 }
 0x278   : > { %814 = vmatprep.subr.bf16.mxu0 %v1077_v37 }
 0x27b   : > { %815 = vmatpush3.bf16.msra.mxu0 %v924_v44 }
 0x27e   : > { %817 = vmatmul.mubr.bf16.vlgmr.msra.gmra.mrb[0].mxu0 %v482_v45 }
 0x351   : > { %v588_v47 = vpop.f32.mrb[0].mxu0 }
 0x352   : > { %v589_v48 = vadd.f32 %v719_v46, %v588_v47  ;;  %v818_v49 = vpop.f32.mrb[1].mxu0 }
 0x353   : > { %v591_v50 = vpop.f32.mrb[2].mxu0 }
 0x354   : > { %594 = vst [vmem:[#allocation8] sm:$0xff] %v589_v48  ;;  %v819_v51 = vpop.f32.mrb[3].mxu0 }
 0x355 PF: > { %p1303_p12 = scmp.eq.s32.totalorder %s688_s18, 6  ;;  %s1079_s21 = smov [#allocation8]  }
 0x356   : > { %s604_s4 = sshll.u32 %s1079_s21, 4  ;;  %s605_s4 = int_to_ptr.vmem [resolvable:$true] %s604_s4 }
 0x357   : > { %s983_s5 = scalar_lea.vmem %s605_s4, 128  ;;  %p990_p11 = scmp.lt.s32.totalorder %s605_s4, %s605_s4 }
 0x358   : > { %p984_p1 = scmp.ne.s32.totalorder %s605_s4, %s983_s5  ;;  %p991_p0 = scmp.lt.s32.totalorder %s983_s5, %s983_s5 }
 0x35a   : > { %p985_p2 = pnand %p984_p1, %p1303_p12  ;;  %p992_p8 = por %p991_p0, %p990_p11 }
 0x35c   : > { %p986_p5 = pneg %p985_p2 }
 0x35e   : > { %p993_p3 = pnand %p992_p8, %p986_p5 }
 0x360   : > { %996 = shalt.err (!%p993_p3)
}
 0x361   : > { %s997_s18 = scalar_lea.hbm %s1350_s3, 128 }
 0x362   : > { %p998_p4 = scmp.ne.s32.totalorder %s1350_s3, %s997_s18  ;;  %p1003_p10 = scmp.lt.u32.totalorder %s997_s18, %s1350_s3 }
 0x364   : > { %p999_p7 = pnand %p998_p4, %p1303_p12 }
 0x366   : > { %p1000_p9 = pneg %p999_p7 }
 0x368   : > { %p1005_p13 = pnand %p1003_p10, %p1000_p9 }
 0x36a   : > { %1008 = shalt.err (!%p1005_p13)
}
 0x36b   : > { %827 = dma.vmem_to_hbm [thread:$0]  (%p1303_p12), %s605_s4, 128, %s1350_s3, [#allocation5]  }
 0x36c   : > { %1042 = dma.done.wait (%p1303_p12), [#allocation5], 128  }
 0x36d   : > { %1044 = vsyncadd (%p1303_p12), [#allocation5], 4294967168 }
 0x36e PF: > { %s18_s17 = sadd.s32 1, %s1067_s17   ;;  %s1367_s12 = smov %s1051_s13 }
 0x36f   : > { %p15_p6 = scmp.ge.s32.totalorder %s18_s17, 9   ;;  %s1368_s13 = smov %s1055_s14 }
 0x370   : > { %s1369_s14 = smov %s1236_s8  ;;  %s1370_s15 = smov %s1063_s16 }
 0x371   : > { %s1371_s16 = smov %s1373_s11  ;;  %17 = sbr.rel (!%p15_p6) target bundleno = 6 (0x6), region = 99 }
 0x378   :  { %617 = vsyncpa [#allocation4], 1 }
 0x379   :  { %619 = vsyncpa [#allocation4 + $0x1], 1 }
 0x37a   :  { %620 = vsyncpa [#allocation7], 1 }
 0x37b   :  { %622 = vsyncpa [#allocation7 + $0x1], 1 }
 0x37c   :  { %623 = vsyncpa [#allocation5], 1 }
 0x37d   :  { %625 = vsyncpa [#allocation5 + $0x1], 1 }

</bundles_post_ra>
